<compile_context>
chip_gen: v7x
topology: tpu7x:2x2x1
jax: 0.10.0
libtpu: 0.0.40
codegen_flags: <defaults>
</compile_context>

<pallas_src>
import functools

import numpy as np
import jax
import jax.numpy as jnp
from jax.experimental import pallas as pl
from jax.experimental.pallas import tpu as pltpu


def _round_up(x, m):
    return ((x + m - 1) // m) * m


def _vmem_caps():
    """Return (per-step tile budget, scoped vmem limit) in bytes, generation-aware."""
    cap = None
    try:
        cap = getattr(pltpu.get_tpu_info(), "vmem_capacity_bytes", None)
    except Exception:
        cap = None
    if not cap or cap <= 0:
        cap = 64 * 1024 * 1024          # conservative: v7x per-TensorCore VMEM
    tile_budget = min(cap // 2, 48 * 1024 * 1024)
    vmem_limit = min((cap * 3) // 4, 100 * 1024 * 1024)
    return int(tile_budget), int(vmem_limit)


# ---------------------------------------------------------------------------
# Fused FFT-power + mask + sum kernel  (FFT_layer -> [:, :, mask] -> sum(-1))
# ---------------------------------------------------------------------------

@functools.lru_cache(maxsize=None)
def _masked_dft_basis_np(n_fft, mask_bytes, n_pad, f_pad, dtype):
    """Masked-bin [cos | -sin] DFT basis with sqrt(2/N) folded in.

    Host numpy array of shape (n_pad, 2*f_pad): columns [:f_pad] hold cos and
    [f_pad:] hold -sin for the masked-in bins (zero past the masked count and
    past n_fft rows, so padding contributes 0 to re^2+im^2).  Built in float64
    with exact integer phase reduction ((n*k) mod N) so large N does not
    accumulate radian-scale phase error, then cast to `dtype` and cached on
    the host (device copy is made per call; nothing device-pinned is cached).
    Note: the 2/N scaling is applied to the DC/Nyquist bins too, matching the
    PyTorch reference (differs from the usual one-sided-PSD convention).
    """
    mask = np.frombuffer(mask_bytes, dtype=np.bool_)
    bins = np.nonzero(mask)[0].astype(np.int64)
    basis = np.zeros((n_pad, 2 * f_pad), dtype=np.float64)
    if bins.size:
        n = np.arange(n_fft, dtype=np.int64)[:, None]
        k = bins[None, :]
        phase = 2.0 * np.pi * ((n * k) % n_fft).astype(np.float64) / float(n_fft)
        amp = np.sqrt(2.0 / float(n_fft))
        basis[:n_fft, :bins.size] = amp * np.cos(phase)
        basis[:n_fft, f_pad:f_pad + bins.size] = -amp * np.sin(phase)
    return basis.astype(dtype)


def _fft_masked_sum_kernel(x_ref, basis_ref, o_ref, acc_ref, *, f_pad):
    # Grid = (M tiles, time/K tiles); K is the reduction axis.
    k = pl.program_id(1)

    @pl.when(k == 0)
    def _():
        acc_ref[...] = jnp.zeros_like(acc_ref)

    # One fused MXU matmul producing [re | im] for all masked bins.
    acc_ref[...] += jnp.dot(x_ref[...], basis_ref[...],
                            preferred_element_type=jnp.float32)

    @pl.when(k == pl.num_programs(1) - 1)
    def _():
        acc = acc_ref[...]
        re = acc[:, :f_pad]
        im = acc[:, f_pad:]
        # sqrt(2/N) is folded into the basis, zero-padded bins give 0 power.
        o_ref[...] = jnp.sum(re * re + im * im, axis=-1,
                             keepdims=True).astype(o_ref.dtype)


def fft_masked_power_sum(x, mask, *, use_bf16=True):
    """sum_k[mask] of 2/N * |fft(x)|^2[..., k].   x: (B, C, N) -> (B, C) f32."""
    B, C, N = x.shape
    half = N // 2
    M = B * C
    mask_np = np.asarray(mask, dtype=bool).reshape(-1)
    assert mask_np.shape[0] == half, (mask_np.shape, half)
    n_masked = int(mask_np.sum())

    dtype = jnp.bfloat16 if use_bf16 else jnp.float32
    elem = 2 if use_bf16 else 4

    n_pad = _round_up(max(N, 128), 128)
    f_pad = max(128, _round_up(max(n_masked, 1), 128))
    m_pad = _round_up(M, 8)

    budget, vmem_limit = _vmem_caps()

    # M tiling: largest divisor of m_pad (in 8-row units) <= cap; keep >=2
    # tiles when M is large enough so both v7x TensorCores get work.
    cap_m = 512
    if m_pad >= 256:
        cap_m = min(cap_m, m_pad // 2)
    qm = m_pad // 8
    tile_m = 8 * max([d for d in range(1, qm + 1)
                      if qm % d == 0 and d * 8 <= cap_m] or [1])

    # K tiling: largest 128-multiple divisor of n_pad fitting the VMEM budget
    # (x + basis double-buffered, f32 accumulator, tiny output).
    fixed = tile_m * 2 * f_pad * 4 + 2 * tile_m * 4
    per_k = 2 * tile_m * elem + 2 * 2 * f_pad * elem
    avail = max(budget - fixed, per_k * 128)
    cap_k = max(128, min(8192, (avail // per_k) // 128 * 128))
    qk = n_pad // 128
    tile_k = 128 * max([d for d in range(1, qk + 1)
                        if qk % d == 0 and d * 128 <= cap_k] or [1])

    basis = jnp.asarray(_masked_dft_basis_np(N, mask_np.tobytes(),
                                             n_pad, f_pad, dtype))

    xf = x.reshape(M, N).astype(dtype)
    if m_pad != M or n_pad != N:
        xf = jnp.pad(xf, ((0, m_pad - M), (0, n_pad - N)))

    grid = (m_pad // tile_m, n_pad // tile_k)
    cost = pl.CostEstimate(
        flops=2 * m_pad * n_pad * (2 * f_pad),
        transcendentals=0,
        bytes_accessed=elem * (m_pad * n_pad + grid[0] * n_pad * 2 * f_pad)
        + 4 * m_pad,
    )

    out = pl.pallas_call(
        functools.partial(_fft_masked_sum_kernel, f_pad=f_pad),
        out_shape=jax.ShapeDtypeStruct((m_pad, 1), jnp.float32),
        grid_spec=pltpu.PrefetchScalarGridSpec(
            num_scalar_prefetch=0,
            grid=grid,
            in_specs=[
                pl.BlockSpec((tile_m, tile_k), lambda i, k: (i, k)),
                pl.BlockSpec((tile_k, 2 * f_pad), lambda i, k: (k, 0)),
            ],
            out_specs=pl.BlockSpec((tile_m, 1), lambda i, k: (i, 0)),
            scratch_shapes=[pltpu.VMEM((tile_m, 2 * f_pad), jnp.float32)],
        ),
        compiler_params=pltpu.CompilerParams(
            dimension_semantics=("parallel", "arbitrary"),
            vmem_limit_bytes=vmem_limit),
        cost_estimate=cost,
    )(xf, basis)

    return out[:M, 0].reshape(B, C)


# ---------------------------------------------------------------------------
# vanilla_regression (fused Linear + folded-BN + ReLU chain)
# ---------------------------------------------------------------------------

def fold_batchnorm(w, b, gamma, beta, running_mean, running_var, eps=1e-5):
    """Fold eval-mode BatchNorm1d into the preceding Linear (w: (din,dout), b: (1,dout))."""
    # TODO(synk): training-mode BatchNorm (batch statistics) is not implemented;
    # the kernel implements inference semantics with running stats folded in.
    scale = gamma / jnp.sqrt(running_var + eps)
    w_eff = w * scale[None, :]
    b_eff = b * scale[None, :] + (beta - running_mean * scale)[None, :]
    return w_eff, b_eff


def _mlp_kernel(x_ref, *rest):
    o_ref = rest[-1]
    wb = rest[:-1]
    n_layers = len(wb) // 2
    h = x_ref[...]
    for i in range(n_layers):
        w = wb[2 * i][...]
        b = wb[2 * i + 1][...]
        h = jnp.dot(h, w, preferred_element_type=jnp.float32) + b
        if i < n_layers - 1:          # ReLU on all but the final Linear
            h = jnp.maximum(h, 0.0)
    o_ref[...] = h.astype(o_ref.dtype)


def mlp_forward(x, params):
    """Fused 5-layer regressor; params = [(w, b)] with BN already folded in."""
    flat = []
    for w, b in params:
        flat.extend([w.astype(jnp.float32), b.astype(jnp.float32)])
    num_classes = params[-1][0].shape[1]
    n_in = 1 + len(flat)
    return pl.pallas_call(
        _mlp_kernel,
        out_shape=jax.ShapeDtypeStruct((x.shape[0], num_classes), jnp.float32),
        in_specs=[pl.BlockSpec(memory_space=pltpu.MemorySpace.VMEM)
                  for _ in range(n_in)],
        out_specs=pl.BlockSpec(memory_space=pltpu.MemorySpace.VMEM),
    )(x.astype(jnp.float32), *flat)


# ---------------------------------------------------------------------------
# Full CardioRespRegression forward
# ---------------------------------------------------------------------------

def cardio_resp_regression_forward(x, feature, mlp_params, mask, *, use_bf16=True):
    # TODO(synk): attention_module path (attention_sig is not None) is not
    # implemented; MyAvgPool1dPadSame is not defined in the provided source.
    B = x.shape[0]
    x_fft_sum = fft_masked_power_sum(x, mask, use_bf16=use_bf16)   # (B, C)
    concat_feature = jnp.concatenate(
        [x_fft_sum, feature.reshape(B, -1).astype(jnp.float32)], axis=1)
    out = mlp_forward(concat_feature, mlp_params)
    return out, concat_feature


# ---------------------------------------------------------------------------
# Pure-JAX references
# ---------------------------------------------------------------------------

def fft_masked_power_sum_ref(x, mask):
    n_fft = x.shape[-1]
    X = jnp.fft.fft(x.astype(jnp.float32), axis=-1)
    p = 2.0 / n_fft * jnp.abs(X[:, :, :n_fft // 2]) ** 2
    maskf = jnp.asarray(np.asarray(mask), jnp.float32)
    return jnp.sum(p * maskf[None, None, :], axis=-1)


def cardio_resp_regression_ref(x, feature, mlp_params, mask):
    B = x.shape[0]
    x_fft_sum = fft_masked_power_sum_ref(x, mask)
    concat_feature = jnp.concatenate(
        [x_fft_sum, feature.reshape(B, -1).astype(jnp.float32)], axis=1)
    h = concat_feature
    for i, (w, b) in enumerate(mlp_params):
        h = jnp.dot(h, w, precision=jax.lax.Precision.HIGHEST) + b
        if i < len(mlp_params) - 1:
            h = jnp.maximum(h, 0.0)
    return h, concat_feature


def _assert_close(a, b, tol, name):
    err = float(jnp.max(jnp.abs(a - b)))
    scale = float(jnp.max(jnp.abs(b))) + 1.0
    assert err <= tol * scale, f"{name}: err={err}, scale={scale}"


if __name__ == "__main__":
    key = jax.random.PRNGKey(0)
    B, C, N = 2, 4, 128          # (batch, channels, signal length)
    half = N // 2
    feat_dim = 4                 # flattened `feature` width
    num_classes = 3
    hidden = 200                 # fixed in the PyTorch module
    n_layers = 5

    k_x, k_f, key = jax.random.split(key, 3)
    x = jax.random.normal(k_x, (B, C, N), dtype=jnp.float32)
    feature = jax.random.normal(k_f, (B, feat_dim), dtype=jnp.float32)

    # Static frequency mask (stand-in for training_params['xf_dict']['mask']).
    mask = np.zeros(half, dtype=bool)
    mask[3:43] = True

    # Regressor params: 4 x (Linear(d,200)+BN+ReLU) + Linear(200,num_classes).
    dims = [C + feat_dim] + [hidden] * (n_layers - 1) + [num_classes]
    params = []
    for i in range(n_layers):
        key, kw, kb = jax.random.split(key, 3)
        w = jax.random.normal(kw, (dims[i], dims[i + 1]), jnp.float32) / np.sqrt(dims[i])
        b = 0.01 * jax.random.normal(kb, (1, dims[i + 1]), jnp.float32)
        if i < n_layers - 1:
            gamma = jnp.ones((dims[i + 1],), jnp.float32)
            beta = jnp.zeros((dims[i + 1],), jnp.float32)
            mean = jnp.zeros((dims[i + 1],), jnp.float32)
            var = jnp.ones((dims[i + 1],), jnp.float32)
            w, b = fold_batchnorm(w, b, gamma, beta, mean, var)
        params.append((w, b))

    # --- Fused masked-power-sum kernel vs jnp.fft reference ---------------
    sum_ref = jax.block_until_ready(fft_masked_power_sum_ref(x, mask))

    sum_f32 = jax.block_until_ready(fft_masked_power_sum(x, mask, use_bf16=False))
    assert sum_f32.shape == (B, C), sum_f32.shape
    _assert_close(sum_f32, sum_ref, 1e-3, "fft_masked_power_sum (f32)")

    sum_bf16 = jax.block_until_ready(fft_masked_power_sum(x, mask, use_bf16=True))
    _assert_close(sum_bf16, sum_ref, 2e-2, "fft_masked_power_sum (bf16)")

    # --- Full forward (default bf16 FFT path) -----------------------------
    out, concat_feature = cardio_resp_regression_forward(x, feature, params, mask)
    out = jax.block_until_ready(out)
    concat_feature = jax.block_until_ready(concat_feature)
    assert out.shape == (B, num_classes), out.shape
    assert concat_feature.shape == (B, C + feat_dim), concat_feature.shape

    out_ref, concat_ref = cardio_resp_regression_ref(x, feature, params, mask)
    out_ref = jax.block_until_ready(out_ref)
    _assert_close(concat_feature, concat_ref, 2e-2, "concat_feature (bf16)")
    _assert_close(out, out_ref, 5e-2, "out (bf16)")

    # --- Full forward, f32 FFT path (tighter tolerances) ------------------
    out32, concat32 = cardio_resp_regression_forward(
        x, feature, params, mask, use_bf16=False)
    out32 = jax.block_until_ready(out32)
    concat32 = jax.block_until_ready(concat32)
    _assert_close(concat32, concat_ref, 5e-3, "concat_feature (f32)")
    _assert_close(out32, out_ref, 2e-2, "out (f32)")

    print("KERNEL_OK")
</pallas_src>

<mosaic_0001>
module attributes {stable_mosaic.version = 11 : i64} {
  func.func @_fft_masked_sum_kernel(%arg0: i32, %arg1: i32, %arg2: memref<8x128xf32, #tpu.memory_space<vmem>>, %arg3: memref<128x256xf32, #tpu.memory_space<vmem>>, %arg4: memref<8x1xf32, #tpu.memory_space<vmem>>, %arg5: memref<8x256xf32, #tpu.memory_space<vmem>>) attributes {dimension_semantics = [#tpu.dimension_semantics<parallel>, #tpu.dimension_semantics<arbitrary>], iteration_bounds = array<i64: 1, 1>, scalar_prefetch = 0 : i64, scratch_operands = 1 : i64, tpu.core_type = #tpu.core_type<tc>, window_params = [{transform_indices = @transform_0, window_bounds = array<i64: 8, 128>}, {transform_indices = @transform_1, window_bounds = array<i64: 128, 256>}, {transform_indices = @transform_2, window_bounds = array<i64: 8, 1>}]} {
    %c0_i32 = arith.constant 0 : i32
    %0 = arith.cmpi eq, %arg1, %c0_i32 : i32
    %1 = arith.extui %0 : i1 to i32
    %c0_i32_0 = arith.constant 0 : i32
    %2 = arith.cmpi ne, %1, %c0_i32_0 : i32
    scf.if %2 {
      %cst_10 = arith.constant 0.000000e+00 : f32
      %12 = vector.broadcast %cst_10 : f32 to vector<8x256xf32>
      %c0_11 = arith.constant 0 : index
      %c0_12 = arith.constant 0 : index
      %13 = vector.load %arg5[%c0_11, %c0_12] : memref<8x256xf32, #tpu.memory_space<vmem>>, vector<8x256xf32>
      tpu.vector_store %arg5[%c0_11, %c0_12], %12 {strides = array<i32>} : memref<8x256xf32, #tpu.memory_space<vmem>>, vector<8x256xf32>,
    } else {
    }
    %c0 = arith.constant 0 : index
    %c0_1 = arith.constant 0 : index
    %3 = vector.load %arg5[%c0, %c0_1] : memref<8x256xf32, #tpu.memory_space<vmem>>, vector<8x256xf32>
    %c0_2 = arith.constant 0 : index
    %c0_3 = arith.constant 0 : index
    %4 = vector.load %arg2[%c0_2, %c0_3] : memref<8x128xf32, #tpu.memory_space<vmem>>, vector<8x128xf32>
    %c0_4 = arith.constant 0 : index
    %c0_5 = arith.constant 0 : index
    %5 = vector.load %arg3[%c0_4, %c0_5] : memref<128x256xf32, #tpu.memory_space<vmem>>, vector<128x256xf32>
    %cst = arith.constant dense<0.000000e+00> : vector<8x256xf32>
    %6 = tpu.matmul %4, %5, %cst {dimension_numbers = #tpu.dot_dimension_numbers<[1], [0], [0], [1], [0, 0, 1, 1], [], []>} : vector<8x128xf32>, vector<128x256xf32>, vector<8x256xf32> -> vector<8x256xf32>
    %7 = arith.addf %3, %6 : vector<8x256xf32>
    %c0_6 = arith.constant 0 : index
    %c0_7 = arith.constant 0 : index
    %8 = vector.load %arg5[%c0_6, %c0_7] : memref<8x256xf32, #tpu.memory_space<vmem>>, vector<8x256xf32>
    tpu.vector_store %arg5[%c0_6, %c0_7], %7 {strides = array<i32>} : memref<8x256xf32, #tpu.memory_space<vmem>>, vector<8x256xf32>,
    %c0_i32_8 = arith.constant 0 : i32
    %9 = arith.cmpi eq, %arg1, %c0_i32_8 : i32
    %10 = arith.extui %9 : i1 to i32
    %c0_i32_9 = arith.constant 0 : i32
    %11 = arith.cmpi ne, %10, %c0_i32_9 : i32
    scf.if %11 {
      %c0_10 = arith.constant 0 : index
      %c0_11 = arith.constant 0 : index
      %12 = vector.load %arg5[%c0_10, %c0_11] : memref<8x256xf32, #tpu.memory_space<vmem>>, vector<8x256xf32>
      %13 = vector.extract_strided_slice %12 {offsets = [0, 0], sizes = [8, 128], strides = [1, 1]} : vector<8x256xf32> to vector<8x128xf32>
      %14 = vector.extract_strided_slice %12 {offsets = [0, 128], sizes = [8, 128], strides = [1, 1]} : vector<8x256xf32> to vector<8x128xf32>
      %15 = arith.mulf %13, %13 : vector<8x128xf32>
      %16 = arith.mulf %14, %14 : vector<8x128xf32>
      %17 = arith.addf %15, %16 : vector<8x128xf32>
      %cst_12 = arith.constant dense<0.000000e+00> : vector<8xf32>
      %18 = vector.multi_reduction <add>, %17, %cst_12 [1] : vector<8x128xf32> to vector<8xf32>
      %19 = vector.shape_cast %18 : vector<8xf32> to vector<8x1xf32>
      %c0_13 = arith.constant 0 : index
      %c0_14 = arith.constant 0 : index
      %20 = vector.load %arg4[%c0_13, %c0_14] : memref<8x1xf32, #tpu.memory_space<vmem>>, vector<8x1xf32>
      tpu.vector_store %arg4[%c0_13, %c0_14], %19 {strides = array<i32>} : memref<8x1xf32, #tpu.memory_space<vmem>>, vector<8x1xf32>,
    } else {
    }
    return
  }
  func.func @transform_0(%arg0: i32, %arg1: i32) -> (i32, i32) {
    %c0_i32 = arith.constant 0 : i32
    return %arg0, %arg1 : i32, i32
  }
  func.func @transform_1(%arg0: i32, %arg1: i32) -> (i32, i32) {
    %c0_i32 = arith.constant 0 : i32
    %c0_i32_0 = arith.constant 0 : i32
    return %arg1, %c0_i32 : i32, i32
  }
  func.func @transform_2(%arg0: i32, %arg1: i32) -> (i32, i32) {
    %c0_i32 = arith.constant 0 : i32
    %c0_i32_0 = arith.constant 0 : i32
    return %arg0, %c0_i32 : i32, i32
  }
}

</mosaic_0001>

<bundles_post_ra>
// kernel: tpu_custom_call.1
= control target key start
LH: loop header
LB: loop body
LE: loop exit
PB: predicated region body
PF: predicated region fallthrough
CT: control target
= control target key end

     0   :  { %7 = vsyncpa [#allocation4], 0  ;;  %s310_s0 = inlined_call_operand.hbm [shape: f32[8,128], index: 0, kind: input, shape index: {}]   ;;  %s311_s1 = inlined_call_operand.hbm [shape: f32[128,256], index: 1, kind: input, shape index: {}]   ;;  %s312_s2 = inlined_call_operand.vmem [shape: f32[8,1], index: 2, kind: output, shape index: {}]  }
   0x1   :  { %8 = vsyncpa [#allocation6], 0  ;;  %s256_s9 = smov [#allocation3]   ;;  %s257_s11 = smov [#allocation5]  }
   0x2   :  { %s15_s10 = sshll.u32 %s256_s9, 4  ;;  %s24_s12 = sshll.u32 %s257_s11, 4  ;;  %s16_s10 = int_to_ptr.vmem [resolvable:$true] %s15_s10  ;;  %s276_s12 = int_to_ptr.vmem [resolvable:$true] %s24_s12 }
   0x3   :  { %s208_s15 = scalar_lea.hbm %s310_s0, 128 }
   0x4   :  { %p209_p0 = scmp.ne.s32.totalorder %s310_s0, %s208_s15  ;;  %p212_p1 = scmp.lt.u32.totalorder %s208_s15, %s310_s0 }
   0x6   :  { %p214_p2 = pnand %p212_p1, %p209_p0 }
   0x8   :  { %217 = shalt.err (!%p214_p2)
}
   0x9   :  { %s218_s20 = scalar_lea.vmem %s16_s10, 128  ;;  %p223_p4 = scmp.lt.s32.totalorder %s16_s10, %s16_s10 }
   0xa   :  { %p219_p3 = scmp.ne.s32.totalorder %s16_s10, %s218_s20  ;;  %p224_p5 = scmp.lt.s32.totalorder %s218_s20, %s218_s20 }
   0xc   :  { %p225_p6 = por %p224_p5, %p223_p4 }
   0xe   :  { %p226_p7 = pnand %p225_p6, %p219_p3 }
  0x10   :  { %229 = shalt.err (!%p226_p7)
}
  0x11   :  { %18 = dma.hbm_to_vmem [thread:$0]  %s310_s0, 128, %s16_s10, [#allocation4]  }
  0x12   :  { %s230_s25 = scalar_lea.hbm %s311_s1, 4096 }
  0x13   :  { %p231_p8 = scmp.ne.s32.totalorder %s311_s1, %s230_s25  ;;  %p234_p9 = scmp.lt.u32.totalorder %s230_s25, %s311_s1 }
  0x15   :  { %p236_p10 = pnand %p234_p9, %p231_p8 }
  0x17   :  { %239 = shalt.err (!%p236_p10)
}
  0x18   :  { %s240_s30 = scalar_lea.vmem %s276_s12, 4096  ;;  %p245_p12 = scmp.lt.s32.totalorder %s276_s12, %s276_s12 }
  0x19   :  { %p241_p11 = scmp.ne.s32.totalorder %s276_s12, %s240_s30  ;;  %p246_p13 = scmp.lt.s32.totalorder %s240_s30, %s240_s30 }
  0x1b   :  { %p247_p0 = por %p246_p13, %p245_p12 }
  0x1d   :  { %p248_p1 = pnand %p247_p0, %p241_p11 }
  0x1f   :  { %251 = shalt.err (!%p248_p1)
}
  0x20   :  { %s258_s0 = smov 256   ;;  %s259_s3 = smov 16  }
  0x21   :  { %30 = dma.hbm_to_vmem [thread:$0]  %s311_s1, 4096, %s276_s12, [#allocation6], %s258_s0, %s258_s0, %s259_s3  }
  0x22   :  { %252 = dma.done.wait [#allocation4], 128  }
  0x23   :  { %253 = vsyncadd [#allocation4], 4294967168 }
  0x24   :  { %254 = dma.done.wait [#allocation6], 4096  }
  0x25   :  { %255 = vsyncadd [#allocation6], 4294963200  ;;  %v260_v0 = vmov 0.0   ;;  %v47_v1 = vld [vmem:[#allocation5 + $0x8] sm:$0xff]  ;;  %v49_v2 = vld [vmem:[#allocation5 + $0x18] sm:$0xff]  ;;  %vm163_vm0 = vcmask 7168  }
  0x26   :  { %142 = vmatprep.mubr.f32.mxu0 %v260_v0  ;;  %v46_v3 = vld [vmem:[#allocation5] sm:$0xff]  ;;  %v171_v4 = vpack.c.bf16 %v49_v2, %v47_v1  ;;  %v48_v5 = vld [vmem:[#allocation5 + $0x10] sm:$0xff]  ;;  %v51_v6 = vld [vmem:[#allocation5 + $0x28] sm:$0xff] }
  0x27   :  { %v53_v7 = vld [vmem:[#allocation5 + $0x38] sm:$0xff]  ;;  %v173_v8 = vpack.c.bf16 %v48_v5, %v46_v3  ;;  %v50_v10 = vld [vmem:[#allocation5 + $0x20] sm:$0xff]  ;;  %v52_v11 = vld [vmem:[#allocation5 + $0x30] sm:$0xff] }
  0x28   :  { %v175_v9 = vpack.c.bf16 %v53_v7, %v51_v6  ;;  %v55_v12 = vld [vmem:[#allocation5 + $0x48] sm:$0xff]  ;;  %172 = vmatprep.subr.bf16.mxu0 %v171_v4  ;;  %v57_v13 = vld [vmem:[#allocation5 + $0x58] sm:$0xff]  ;;  %v177_v14 = vpack.c.bf16 %v52_v11, %v50_v10  ;;  %v54_v16 = vld [vmem:[#allocation5 + $0x40] sm:$0xff] }
  0x29   :  { %174 = vmatpush1.bf16.msra.mxu0 %v173_v8  ;;  %v179_v15 = vpack.c.bf16 %v57_v13, %v55_v12  ;;  %v56_v17 = vld [vmem:[#allocation5 + $0x50] sm:$0xff]  ;;  %v59_v18 = vld [vmem:[#allocation5 + $0x68] sm:$0xff]  ;;  %v61_v19 = vld [vmem:[#allocation5 + $0x78] sm:$0xff] }
  0x2a   :  { %176 = vmatprep.subr.bf16.mxu0 %v175_v9  ;;  %v181_v20 = vpack.c.bf16 %v56_v17, %v54_v16  ;;  %v183_v21 = vpack.c.bf16 %v61_v19, %v59_v18  ;;  %v58_v22 = vld [vmem:[#allocation5 + $0x60] sm:$0xff]  ;;  %v60_v23 = vld [vmem:[#allocation5 + $0x70] sm:$0xff]  ;;  %v63_v24 = vld [vmem:[#allocation5 + $0x88] sm:$0xff] }
  0x2b   :  { %v65_v25 = vld [vmem:[#allocation5 + $0x98] sm:$0xff]  ;;  %v185_v26 = vpack.c.bf16 %v60_v23, %v58_v22  ;;  %v62_v28 = vld [vmem:[#allocation5 + $0x80] sm:$0xff]  ;;  %v64_v29 = vld [vmem:[#allocation5 + $0x90] sm:$0xff] }
  0x2c   :  { %v187_v27 = vpack.c.bf16 %v65_v25, %v63_v24  ;;  %v67_v30 = vld [vmem:[#allocation5 + $0xa8] sm:$0xff]  ;;  %v69_v31 = vld [vmem:[#allocation5 + $0xb8] sm:$0xff]  ;;  %v189_v32 = vpack.c.bf16 %v64_v29, %v62_v28  ;;  %v66_v34 = vld [vmem:[#allocation5 + $0xa0] sm:$0xff] }
  0x2d   :  { %178 = vmatpush1.bf16.msra.mxu0 %v177_v14  ;;  %v191_v33 = vpack.c.bf16 %v69_v31, %v67_v30  ;;  %v68_v35 = vld [vmem:[#allocation5 + $0xb0] sm:$0xff]  ;;  %v71_v36 = vld [vmem:[#allocation5 + $0xc8] sm:$0xff]  ;;  %v73_v37 = vld [vmem:[#allocation5 + $0xd8] sm:$0xff] }
  0x2e   :  { %180 = vmatprep.subr.bf16.mxu0 %v179_v15  ;;  %v193_v38 = vpack.c.bf16 %v68_v35, %v66_v34  ;;  %v195_v39 = vpack.c.bf16 %v73_v37, %v71_v36  ;;  %v70_v40 = vld [vmem:[#allocation5 + $0xc0] sm:$0xff]  ;;  %v72_v41 = vld [vmem:[#allocation5 + $0xd0] sm:$0xff]  ;;  %v75_v42 = vld [vmem:[#allocation5 + $0xe8] sm:$0xff] }
  0x2f   :  { %v77_v43 = vld [vmem:[#allocation5 + $0xf8] sm:$0xff]  ;;  %v197_v44 = vpack.c.bf16 %v72_v41, %v70_v40  ;;  %v74_v46 = vld [vmem:[#allocation5 + $0xe0] sm:$0xff]  ;;  %v76_v47 = vld [vmem:[#allocation5 + $0xf0] sm:$0xff] }
  0x30   :  { %v199_v45 = vpack.c.bf16 %v77_v43, %v75_v42  ;;  %v201_v48 = vpack.c.bf16 %v76_v47, %v74_v46  ;;  %v45_v49 = vld [vmem:[#allocation3] sm:$0xff] }
  0x31   :  { %182 = vmatpush1.bf16.msra.mxu0 %v181_v20 }
  0x32   :  { %184 = vmatprep.subr.bf16.mxu0 %v183_v21 }
  0x35   :  { %186 = vmatpush1.bf16.msra.mxu0 %v185_v26 }
  0x36   :  { %188 = vmatprep.subr.bf16.mxu0 %v187_v27 }
  0x39   :  { %190 = vmatpush1.bf16.msra.mxu0 %v189_v32 }
  0x3a   :  { %192 = vmatprep.subr.bf16.mxu0 %v191_v33 }
  0x3d   :  { %194 = vmatpush1.bf16.msra.mxu0 %v193_v38 }
  0x3e   :  { %196 = vmatprep.subr.bf16.mxu0 %v195_v39 }
  0x41   :  { %198 = vmatpush1.bf16.msra.mxu0 %v197_v44 }
  0x42   :  { %200 = vmatprep.subr.bf16.mxu0 %v199_v45 }
  0x45   :  { %202 = vmatpush1.bf16.msra.mxu0 %v201_v48 }
  0x48   :  { %143 = vmatmul.mubr.f32.vlgmr.msra.gmra.mrb[0].mxu0 %v45_v49 }
 0x11b   :  { %v144_v50 = vpop.f32.mrb[0].mxu0 }
 0x11c   :  { %v158_v51 = vmul.f32 %v144_v50, %v144_v50  ;;  %v146_v52 = vpop.f32.mrb[1].mxu0 }
 0x11d   :  { %v159_v53 = vmul.f32 %v146_v52, %v146_v52 }
 0x11f   :  { %v160_v54 = vadd.f32 %v159_v53, %v158_v51 }
 0x121   :  { %161 = vadd.xlane.f32.xlu0 %v160_v54 }
 0x1ae   :  { %v162_v55 = vpop.xlane.xlu0 %161 }
 0x1af   :  { %164 = vst.msk [vmem:[%s312_s2] sm:$0xff] %vm163_vm0, %v162_v55 }
 0x1b0   :  { %169 = vsyncpa [#allocation4], 1 }
 0x1b1   :  { %170 = vsyncpa [#allocation6], 1 }

</bundles_post_ra>
